<compile_context>
chip_gen: v7x
topology: tpu7x:2x2x1
jax: 0.10.0
libtpu: 0.0.40
codegen_flags: <defaults>
</compile_context>

<pallas_src>
import jax
import jax.numpy as jnp
from jax.experimental import pallas as pl
from jax.experimental.pallas import tpu as pltpu


def _round_up(x, m):
    return ((x + m - 1) // m) * m


def _vmem_capacity_bytes():
    """Physical VMEM per TensorCore; conservative 64 MiB fallback (v7x-class)."""
    try:
        return int(pltpu.get_tpu_info().vmem_capacity_bytes)
    except Exception:
        return 64 * 1024 * 1024


def task_block_kernel(x_ref, w1_ref, b1_ref, w2_ref, b2_ref, o_ref):
    """One (batch-tile, k-tile) step of the fused fc7 -> ReLU -> Linear head.

    x_ref  : (tm, D)     bf16  activations (full fc7 reduction dim resident)
    w1_ref : (D, tk)     bf16  fc7 weight column slab (pre-transposed, in x out)
    b1_ref : (1, tk)     f32   fc7 bias slice
    w2_ref : (tk, Cpad)  bf16  common_path weight row slab (pre-transposed)
    b2_ref : (1, Cpad)   f32   common_path bias
    o_ref  : (tm, Cpad)  f32   output tile; block index is constant over k, so it
                               stays VMEM-resident and doubles as the accumulator.
    """
    k = pl.program_id(1)

    @pl.when(k == 0)
    def _():
        o_ref[...] = jnp.zeros_like(o_ref)

    # fc7 slice: h = ReLU(x @ W1[:, k-tile] + b1[k-tile]); Dropout = identity (eval).
    h = jnp.dot(x_ref[...], w1_ref[...], preferred_element_type=jnp.float32)
    h = jnp.maximum(h + b1_ref[...], 0.0)

    # common_path partial product accumulated straight into the resident output.
    o_ref[...] += jnp.dot(h.astype(w2_ref.dtype), w2_ref[...],
                          preferred_element_type=jnp.float32)

    @pl.when(k == pl.num_programs(1) - 1)
    def _():
        o_ref[...] += b2_ref[...]


def prepare_task_block_params(w1, b1, w2, b2):
    """One-time parameter prep (do this at load time, NOT per forward call).

    w1: (D, D)  fc7 weight, pre-transposed (in, out)
    b1: (1, D)  fc7 bias
    w2: (D, C)  common_path weight, pre-transposed (in, out)
    b2: (1, C)  common_path bias
    """
    D = w1.shape[0]
    C = w2.shape[1]
    assert w1.shape == (D, D) and w2.shape[0] == D
    assert b1.shape == (1, D) and b2.shape == (1, C)

    c_pad = _round_up(max(C, 128), 128)          # lane-dense output last dim
    if c_pad != C:
        w2 = jnp.pad(w2, ((0, 0), (0, c_pad - C)))
        b2 = jnp.pad(b2, ((0, 0), (0, c_pad - C)))

    return {
        "w1": w1.astype(jnp.bfloat16),
        "b1": b1.astype(jnp.float32),
        "w2": w2.astype(jnp.bfloat16),
        "b2": b2.astype(jnp.float32),
        "d": D,
        "out_c": C,
        "c_pad": c_pad,
    }


def task_block_forward(x, params, *, tm=None, tk=None, vmem_limit_bytes=None,
                       w1_buffers=3):
    """Fused eval-mode task_block head.

    x      : (B, D) activations (cast to bf16 for the MXU)
    params : output of prepare_task_block_params (bf16 weights, padded head)
    returns (B, C) float32
    """
    w1, b1, w2, b2 = params["w1"], params["b1"], params["w2"], params["b2"]
    D, c_pad, C = params["d"], params["c_pad"], params["out_c"]
    B = x.shape[0]
    assert x.shape[1] == D

    vmem_cap = _vmem_capacity_bytes()
    small_vmem = vmem_cap <= 64 * 1024 * 1024     # v7x-class (64 MiB / TC)
    tm_cap = 512 if small_vmem else 1024
    tk_cap = 512 if small_vmem else 1024

    # --- batch tile -----------------------------------------------------------
    if tm is None:
        if B <= 256:
            tm = _round_up(max(B, 1), 16)          # whole batch as one MXU M-tile
        else:
            nb = _round_up(B, 256) // 256
            # at least 2 batch tiles so the "parallel" axis shards across cores
            tm = min(tm_cap, 256 * max(1, nb // 2))
    bp = _round_up(B, tm)                          # padded batch, multiple of tm

    # --- reduction (fc7-output-feature) tile ----------------------------------
    if tk is None:
        tk = D
        for cand in (1024, 512, 256, 128):
            if cand <= tk_cap and D % cand == 0:
                tk = cand
                break
    assert D % tk == 0 and (tk % 128 == 0 or tk == D)

    # --- activations: bf16 + ragged-batch zero padding (cheap, B*D only) -------
    x16 = x.astype(jnp.bfloat16)
    if bp != B:
        x16 = jnp.pad(x16, ((0, bp - B), (0, 0)))

    # --- VMEM budget -----------------------------------------------------------
    need = (2 * tm * D * 2                      # x tile, double-buffered
            + w1_buffers * D * tk * 2           # W1 slabs
            + 2 * max(tk, 128) * 4              # b1 slice
            + 2 * tk * c_pad * 2                # W2 slabs
            + 2 * c_pad * 4                     # b2
            + 2 * tm * c_pad * 4)               # resident output/accumulator
    if vmem_limit_bytes is None:
        vmem_limit_bytes = int(min(max(2 * need, 32 * 1024 * 1024),
                                   0.75 * vmem_cap))

    grid = (bp // tm, D // tk)                  # batch outermost, reduction inner

    def _call(use_buffered):
        if use_buffered and w1_buffers > 1:
            w1_spec = pl.BlockSpec((D, tk), lambda b, k: (0, k),
                                   pipeline_mode=pl.Buffered(w1_buffers))
        else:
            w1_spec = pl.BlockSpec((D, tk), lambda b, k: (0, k))
        return pl.pallas_call(
            task_block_kernel,
            out_shape=jax.ShapeDtypeStruct((bp, c_pad), jnp.float32),
            grid_spec=pltpu.PrefetchScalarGridSpec(
                num_scalar_prefetch=0,
                grid=grid,
                in_specs=[
                    pl.BlockSpec((tm, D), lambda b, k: (b, 0)),      # x tile
                    w1_spec,                                         # fc7 W cols
                    pl.BlockSpec((1, tk), lambda b, k: (0, k)),      # fc7 bias
                    pl.BlockSpec((tk, c_pad), lambda b, k: (k, 0)),  # head W rows
                    pl.BlockSpec((1, c_pad), lambda b, k: (0, 0)),   # head bias
                ],
                out_specs=pl.BlockSpec((tm, c_pad), lambda b, k: (b, 0)),
            ),
            compiler_params=pltpu.CompilerParams(
                dimension_semantics=("parallel", "arbitrary"),
                vmem_limit_bytes=vmem_limit_bytes,
            ),
        )(x16, w1, b1, w2, b2)

    try:
        out = _call(True)
    except Exception:
        # Fallback for jax versions without BlockSpec(pipeline_mode=pl.Buffered(n)).
        out = _call(False)

    return out[:B, :C]


def task_block_reference(x, w1, b1, w2, b2):
    """f32 reference applying the same bf16 weight/activation quantization."""
    xf = x.astype(jnp.bfloat16).astype(jnp.float32)
    w1f = w1.astype(jnp.bfloat16).astype(jnp.float32)
    w2f = w2.astype(jnp.bfloat16).astype(jnp.float32)
    h = jnp.maximum(xf @ w1f + b1, 0.0)
    h = h.astype(jnp.bfloat16).astype(jnp.float32)
    return h @ w2f + b2


def _run_case(key, B, D, C, tk=None):
    kx, kw1, kb1, kw2, kb2 = jax.random.split(key, 5)
    x = jax.random.normal(kx, (B, D), dtype=jnp.float32)
    # fc7 (VGG16 classifier Linear D->D), stored pre-transposed as (in, out)
    w1 = jax.random.normal(kw1, (D, D), dtype=jnp.float32) * (1.0 / D) ** 0.5
    b1 = jax.random.normal(kb1, (1, D), dtype=jnp.float32) * 0.01
    # common_path Linear(D -> C), stored pre-transposed as (in, out)
    w2 = jax.random.normal(kw2, (D, C), dtype=jnp.float32) * (1.0 / D) ** 0.5
    b2 = jax.random.normal(kb2, (1, C), dtype=jnp.float32) * 0.01

    params = prepare_task_block_params(w1, b1, w2, b2)   # one-time prep
    out = task_block_forward(x, params, tk=tk)
    out = jax.block_until_ready(out)

    ref = task_block_reference(x, w1, b1, w2, b2)
    assert out.shape == (B, C)
    assert jnp.allclose(out, ref, atol=2e-2, rtol=2e-2), "mismatch vs reference"


if __name__ == "__main__":
    # Small stand-in shapes for the real module (B, 4096) -> fc7(4096) -> out_c.
    key = jax.random.PRNGKey(0)
    k1, k2 = jax.random.split(key)

    # tk=128 forces 4 reduction steps: exercises the resident-output accumulator,
    # the Buffered W1 stream and the lane-padded head.
    _run_case(k1, B=8, D=512, C=10, tk=128)
    # Ragged batch (B not a multiple of the tile) + single k step + default tk.
    _run_case(k2, B=20, D=256, C=5)

    print("KERNEL_OK")
</pallas_src>

<mosaic_0001>
module attributes {stable_mosaic.version = 11 : i64} {
  func.func @task_block_kernel(%arg0: i32, %arg1: i32, %arg2: memref<16x512xbf16, #tpu.memory_space<vmem>>, %arg3: memref<512x128xbf16, #tpu.memory_space<vmem>>, %arg4: memref<1x128xf32, #tpu.memory_space<vmem>>, %arg5: memref<128x128xbf16, #tpu.memory_space<vmem>>, %arg6: memref<1x128xf32, #tpu.memory_space<vmem>>, %arg7: memref<16x128xf32, #tpu.memory_space<vmem>>) attributes {dimension_semantics = [#tpu.dimension_semantics<parallel>, #tpu.dimension_semantics<arbitrary>], iteration_bounds = array<i64: 1, 4>, scalar_prefetch = 0 : i64, scratch_operands = 0 : i64, tpu.core_type = #tpu.core_type<tc>, window_params = [{transform_indices = @transform_0, window_bounds = array<i64: 16, 512>}, {transform_indices = @transform_1, window_bounds = array<i64: 512, 128>}, {transform_indices = @transform_2, window_bounds = array<i64: 1, 128>}, {transform_indices = @transform_3, window_bounds = array<i64: 128, 128>}, {pipeline_mode = #tpu.pipeline_mode<synchronous>, transform_indices = @transform_4, window_bounds = array<i64: 1, 128>}, {transform_indices = @transform_5, window_bounds = array<i64: 16, 128>}]} {
    %c0_i32 = arith.constant 0 : i32
    %0 = arith.cmpi eq, %arg1, %c0_i32 : i32
    %1 = arith.extui %0 : i1 to i32
    %c0_i32_0 = arith.constant 0 : i32
    %2 = arith.cmpi ne, %1, %c0_i32_0 : i32
    scf.if %2 {
      %cst_15 = arith.constant 0.000000e+00 : f32
      %20 = vector.broadcast %cst_15 : f32 to vector<16x128xf32>
      %c0_16 = arith.constant 0 : index
      %c0_17 = arith.constant 0 : index
      %21 = vector.load %arg7[%c0_16, %c0_17] : memref<16x128xf32, #tpu.memory_space<vmem>>, vector<16x128xf32>
      tpu.vector_store %arg7[%c0_16, %c0_17], %20 {strides = array<i32>} : memref<16x128xf32, #tpu.memory_space<vmem>>, vector<16x128xf32>,
    } else {
    }
    %c0 = arith.constant 0 : index
    %c0_1 = arith.constant 0 : index
    %3 = vector.load %arg2[%c0, %c0_1] : memref<16x512xbf16, #tpu.memory_space<vmem>>, vector<16x512xbf16>
    %c0_2 = arith.constant 0 : index
    %c0_3 = arith.constant 0 : index
    %4 = vector.load %arg3[%c0_2, %c0_3] : memref<512x128xbf16, #tpu.memory_space<vmem>>, vector<512x128xbf16>
    %cst = arith.constant dense<0.000000e+00> : vector<16x128xf32>
    %5 = tpu.matmul %3, %4, %cst {dimension_numbers = #tpu.dot_dimension_numbers<[1], [0], [0], [1], [0, 0, 1, 1], [], []>} : vector<16x512xbf16>, vector<512x128xbf16>, vector<16x128xf32> -> vector<16x128xf32>
    %c0_4 = arith.constant 0 : index
    %c0_5 = arith.constant 0 : index
    %6 = vector.load %arg4[%c0_4, %c0_5] : memref<1x128xf32, #tpu.memory_space<vmem>>, vector<1x128xf32>
    %7 = vector.broadcast %6 : vector<1x128xf32> to vector<16x128xf32>
    %8 = arith.addf %5, %7 : vector<16x128xf32>
    %cst_6 = arith.constant 0.000000e+00 : f32
    %9 = vector.broadcast %cst_6 : f32 to vector<16x128xf32>
    %10 = arith.maximumf %8, %9 : vector<16x128xf32>
    %c0_7 = arith.constant 0 : index
    %c0_8 = arith.constant 0 : index
    %11 = vector.load %arg7[%c0_7, %c0_8] : memref<16x128xf32, #tpu.memory_space<vmem>>, vector<16x128xf32>
    %12 = arith.truncf %10 : vector<16x128xf32> to vector<16x128xbf16>
    %c0_9 = arith.constant 0 : index
    %c0_10 = arith.constant 0 : index
    %13 = vector.load %arg5[%c0_9, %c0_10] : memref<128x128xbf16, #tpu.memory_space<vmem>>, vector<128x128xbf16>
    %cst_11 = arith.constant dense<0.000000e+00> : vector<16x128xf32>
    %14 = tpu.matmul %12, %13, %cst_11 {dimension_numbers = #tpu.dot_dimension_numbers<[1], [0], [0], [1], [0, 0, 1, 1], [], []>} : vector<16x128xbf16>, vector<128x128xbf16>, vector<16x128xf32> -> vector<16x128xf32>
    %15 = arith.addf %11, %14 : vector<16x128xf32>
    %c0_12 = arith.constant 0 : index
    %c0_13 = arith.constant 0 : index
    %16 = vector.load %arg7[%c0_12, %c0_13] : memref<16x128xf32, #tpu.memory_space<vmem>>, vector<16x128xf32>
    tpu.vector_store %arg7[%c0_12, %c0_13], %15 {strides = array<i32>} : memref<16x128xf32, #tpu.memory_space<vmem>>, vector<16x128xf32>,
    %c3_i32 = arith.constant 3 : i32
    %17 = arith.cmpi eq, %arg1, %c3_i32 : i32
    %18 = arith.extui %17 : i1 to i32
    %c0_i32_14 = arith.constant 0 : i32
    %19 = arith.cmpi ne, %18, %c0_i32_14 : i32
    scf.if %19 {
      %c0_15 = arith.constant 0 : index
      %c0_16 = arith.constant 0 : index
      %20 = vector.load %arg7[%c0_15, %c0_16] : memref<16x128xf32, #tpu.memory_space<vmem>>, vector<16x128xf32>
      %c0_17 = arith.constant 0 : index
      %c0_18 = arith.constant 0 : index
      %21 = vector.load %arg6[%c0_17, %c0_18] : memref<1x128xf32, #tpu.memory_space<vmem>>, vector<1x128xf32>
      %22 = vector.broadcast %21 : vector<1x128xf32> to vector<16x128xf32>
      %23 = arith.addf %20, %22 : vector<16x128xf32>
      %c0_19 = arith.constant 0 : index
      %c0_20 = arith.constant 0 : index
      %24 = vector.load %arg7[%c0_19, %c0_20] : memref<16x128xf32, #tpu.memory_space<vmem>>, vector<16x128xf32>
      tpu.vector_store %arg7[%c0_19, %c0_20], %23 {strides = array<i32>} : memref<16x128xf32, #tpu.memory_space<vmem>>, vector<16x128xf32>,
    } else {
    }
    return
  }
  func.func @transform_0(%arg0: i32, %arg1: i32) -> (i32, i32) {
    %c0_i32 = arith.constant 0 : i32
    %c0_i32_0 = arith.constant 0 : i32
    return %arg0, %c0_i32 : i32, i32
  }
  func.func @transform_1(%arg0: i32, %arg1: i32) -> (i32, i32) {
    %c0_i32 = arith.constant 0 : i32
    %c0_i32_0 = arith.constant 0 : i32
    return %c0_i32, %arg1 : i32, i32
  }
  func.func @transform_2(%arg0: i32, %arg1: i32) -> (i32, i32) {
    %c0_i32 = arith.constant 0 : i32
    %c0_i32_0 = arith.constant 0 : i32
    return %c0_i32, %arg1 : i32, i32
  }
  func.func @transform_3(%arg0: i32, %arg1: i32) -> (i32, i32) {
    %c0_i32 = arith.constant 0 : i32
    %c0_i32_0 = arith.constant 0 : i32
    return %arg1, %c0_i32 : i32, i32
  }
  func.func @transform_4(%arg0: i32, %arg1: i32) -> (i32, i32) {
    %c0_i32 = arith.constant 0 : i32
    %c0_i32_0 = arith.constant 0 : i32
    %c0_i32_1 = arith.constant 0 : i32
    return %c0_i32, %c0_i32_0 : i32, i32
  }
  func.func @transform_5(%arg0: i32, %arg1: i32) -> (i32, i32) {
    %c0_i32 = arith.constant 0 : i32
    %c0_i32_0 = arith.constant 0 : i32
    return %arg0, %c0_i32 : i32, i32
  }
}

</mosaic_0001>

<bundles_post_ra>
// kernel: tpu_custom_call.1
= control target key start
LH: loop header
LB: loop body
LE: loop exit
PB: predicated region body
PF: predicated region fallthrough
CT: control target
= control target key end

     0   :  { %s1730_s0 = inlined_call_operand.hbm [shape: bf16[16,512], index: 0, kind: input, shape index: {}]   ;;  %s1731_s1 = inlined_call_operand.hbm [shape: bf16[512,512], index: 1, kind: input, shape index: {}]   ;;  %s1732_s2 = inlined_call_operand.vmem [shape: f32[1,512], index: 2, kind: input, shape index: {}]   ;;  %s1733_s3 = inlined_call_operand.hbm [shape: bf16[512,128], index: 3, kind: input, shape index: {}]   ;;  %s1734_s4 = inlined_call_operand.vmem [shape: f32[1,128], index: 4, kind: input, shape index: {}]   ;;  %s1735_s5 = inlined_call_operand.hbm [shape: f32[16,128], index: 5, kind: output, shape index: {}]  }
   0x1   :  { %1745 = sst [smem:[#allocation12_spill]] %s1731_s1 }
   0x2   :  { %10 = vsyncpa [#allocation3], 0 }
   0x3   :  { %11 = vsyncpa [#allocation6], 0 }
   0x4   :  { %13 = vsyncpa [#allocation6 + $0x1], 0 }
   0x5   :  { %14 = vsyncpa [#allocation4], 0  ;;  %s1437_s18 = smov 0   ;;  %s1439_s19 = smov 0  }
   0x6   :  { %s1441_s20 = smov 0   ;;  %s1443_s21 = smov 0  }
   0x7   :  { %s1445_s22 = smov 0   ;;  %s1447_s23 = smov 0  }
   0x8 LB: > { %s29_s24 = sadd.s32 1, %s1388_s22  ;;  %s65_s25 = sadd.s32 1, %s1380_s20  ;;  %s1392_s23 = sphi %s1447_s23, %s20_s23   ;;  %s1388_s22 = sphi %s1445_s22, %s1765_s22   ;;  %s1384_s21 = sphi %s1443_s21, %s1764_s21   ;;  %s1380_s20 = sphi %s1441_s20, %s1763_s20   ;;  %s1376_s19 = sphi %s1439_s19, %s1762_s19   ;;  %s1372_s18 = sphi %s1437_s18, %s1761_s18  }
   0x9   : > { %p30_p0 = scmp.ge.s32.totalorder %s29_s24, 4  ;;  %p72_p1 = scmp.ne.s32.totalorder %s1380_s20, %s1376_s19 }
   0xa   : > { %p73_p2 = scmp.eq.s32.totalorder %s1392_s23, 0  ;;  %p1111_p4 = scmp.lt.s32.totalorder %s1392_s23, 4 }
   0xb   : > { %s1767_s24 = smov (%p30_p0, %s29_s24), 0  ;;  %s221_s27 = sand.u32 1, %s1392_s23  }
   0xc   : > { %p74_p3 = por %p73_p2, %p72_p1  ;;  %s62_s26 = ssub.s32 %s1388_s22, %s1767_s24 }
   0xd   : > { %p63_p5 = scmp.eq.s32.totalorder %s62_s26, 0  ;;  %s223_s28 = sand.u32 1, %s1380_s20  }
   0xe   : > { %s952_s30 = sshll.u32 %s223_s28, 8  ;;  %s953_s6 = sshll.u32 %s1388_s22, 6 }
   0xf   : > { %s1480_s29 = scalar_select %p63_p5, %s1380_s20, %s65_s25  }
  0x10   : > { %s1746_s1 = sld [smem:[#allocation12_spill]]  ;;  %s225_s10 = scalar_lea.vmem [#allocation5], %s952_s30 }
  0x11   : > { %s231_s11 = sshll.u32 %s225_s10, 4  ;;  %p1490_p6 = pnand %p1111_p4, %p74_p3  ;;  %s1494_s11 = int_to_ptr.vmem [resolvable:$true] %s231_s11 }
  0x12   : > { %s1496_s13 = scalar_lea.sflag [#allocation6], %s221_s27 }
  0x13   : > { %s1747_s12 = scalar_select %p1490_p6, 1, 0 }
  0x14   : > { %p1740_p8 = pneg %p1490_p6 }
  0x16   : > { %s1488_s9 = scalar_lea.hbm %s1746_s1, %s953_s6  ;;  %s1225_s17 = scalar_lea.hbm %s1746_s1, 16384 }
  0x17   : > { %s1220_s14 = scalar_lea.hbm %s1488_s9, 4096  ;;  %p1226_p11 = scmp.lt.u32.totalorder %s1488_s9, %s1746_s1 }
  0x18   : > { %p1221_p7 = scmp.ne.s32.totalorder %s1488_s9, %s1220_s14  ;;  %p1227_p12 = scmp.lt.u32.totalorder %s1225_s17, %s1220_s14 }
  0x19   : > { %p1229_p0 = scmp.lt.u32.totalorder %s1220_s14, %s1488_s9 }
  0x1a   : > { %p1223_p9 = pnand %p1740_p8, %p1221_p7  ;;  %p1228_p13 = por %p1227_p12, %p1226_p11 }
  0x1c   : > { %p1224_p10 = pneg %p1223_p9  ;;  %p1230_p1 = por %p1229_p0, %p1228_p13 }
  0x1e   : > { %p1231_p2 = pnand %p1230_p1, %p1224_p10 }
  0x20   : > { %1234 = shalt.err (!%p1231_p2)
}
  0x21   : > { %s1235_s27 = scalar_lea.vmem %s1494_s11, 4096  ;;  %s1394_s30 = smov [#allocation5]  }
  0x22   : > { %p1236_p3 = scmp.ne.s32.totalorder %s1494_s11, %s1235_s27  ;;  %s1240_s6 = sshll.u32 %s1394_s30, 4  ;;  %s1241_s6 = int_to_ptr.vmem [resolvable:$false] %s1240_s6 }
  0x23   : > { %s1242_s7 = scalar_lea.vmem %s1241_s6, 8192  ;;  %p1243_p7 = scmp.lt.s32.totalorder %s1494_s11, %s1241_s6 }
  0x24   : > { %p1238_p4 = pnand %p1236_p3, %p1740_p8  ;;  %p1244_p9 = scmp.lt.s32.totalorder %s1242_s7, %s1235_s27 }
  0x26   : > { %p1239_p5 = pneg %p1238_p4  ;;  %p1245_p11 = por %p1244_p9, %p1243_p7 }
  0x28   : > { %p1246_p12 = pnand %p1245_p11, %p1239_p5 }
  0x2a   : > { %1249 = shalt.err (!%p1246_p12)
}
  0x2b   : > { %s1738_s8 = smov 256   ;;  %s1736_s10 = smov 64  }
  0x2c   : > { %s1737_s14 = smov 4   ;;  %s1528_s15 = sadd.s32 4294967295, %s1392_s23  }
  0x2d   : > { %1106 = dma.hbm_to_vmem [thread:$0]  (!%p1490_p6), %s1488_s9, 4096, %s1494_s11, %s1496_s13, %s1738_s8, %s1736_s10, %s1737_s14  }
  0x2e   : > { %p78_p10 = scmp.ne.s32.totalorder %s1376_s19, %s1372_s18  ;;  %p1739_p13 = scmp.eq.s32.totalorder %s1528_s15, 0 }
  0x2f   : > { %p949_p0 = scmp.ge.s32.totalorder %s1392_s23, 1  ;;  %p188_p1 = scmp.lt.s32.totalorder %s1392_s23, 5 }
  0x30   : > { %p1537_p2 = por %p1739_p13, %p78_p10  ;;  %s1398_s9 = smov [#allocation2]  }
  0x31   : > { %p1541_p3 = pnand %p949_p0, %p188_p1  ;;  %s204_s11 = sshll.u32 %s1398_s9, 4  ;;  %s1545_s11 = int_to_ptr.vmem [resolvable:$true] %s204_s11 }
  0x32   : > { %s1748_s16 = scalar_select %p1537_p2, 1, 0 }
  0x33   : > { %s1749_s17 = scalar_select %p1541_p3, 1, 0 }
  0x34   : > { %p1099_p4 = pneg %p1541_p3  ;;  %s954_s18 = sshll.u32 %s223_s28, 6 }
  0x35   : > { %s1013_s25 = sshll.u32 %s1388_s22, 10  ;;  %s251_s7 = scalar_lea.vmem [#allocation7], %s954_s18 }
  0x36   : > { %p1554_p5 = pnand %p1099_p4, %p1739_p13  ;;  %s1561_s6 = scalar_lea.hbm %s1733_s3, %s1013_s25 }
  0x37   : > { %s258_s9 = sshll.u32 %s251_s7, 4  ;;  %s1250_s28 = scalar_lea.hbm %s1730_s0, 512  ;;  %s1563_s9 = int_to_ptr.vmem [resolvable:$true] %s258_s9 }
  0x38   : > { %p1251_p7 = scmp.ne.s32.totalorder %s1730_s0, %s1250_s28  ;;  %p1252_p9 = pneg %p1554_p5 }
  0x39   : > { %p1257_p10 = scmp.lt.u32.totalorder %s1250_s28, %s1730_s0 }
  0x3a   : > { %p1253_p11 = pnand %p1252_p9, %p1251_p7 }
  0x3c   : > { %p1254_p12 = pneg %p1253_p11 }
  0x3e   : > { %p1259_p0 = pnand %p1257_p10, %p1254_p12 }
  0x40   : > { %1262 = shalt.err (!%p1259_p0)
}
  0x41   : > { %s1263_s18 = scalar_lea.vmem %s1545_s11, 512  ;;  %p1271_p8 = scmp.lt.s32.totalorder %s1545_s11, %s1545_s11 }
  0x42   : > { %p1264_p1 = scmp.ne.s32.totalorder %s1545_s11, %s1263_s18  ;;  %p1272_p2 = scmp.lt.s32.totalorder %s1263_s18, %s1263_s18 }
  0x44   : > { %p1266_p4 = pnand %p1264_p1, %p1252_p9  ;;  %p1273_p3 = por %p1272_p2, %p1271_p8 }
  0x46   : > { %p1267_p13 = pneg %p1266_p4 }
  0x48   : > { %p1274_p6 = pnand %p1273_p3, %p1267_p13 }
  0x4a   : > { %1277 = shalt.err (!%p1274_p6)
}
  0x4b   : > { %s1399_s1 = smov 16   ;;  %s1751_s8 = smov 256  }
  0x4c   : > { %1102 = dma.hbm_to_vmem [thread:$0]  (!%p1554_p5), %s1730_s0, 512, %s1545_s11, [#allocation3], %s1751_s8, %s1751_s8, %s1399_s1  }
  0x4d   : > { %s1278_s25 = scalar_lea.hbm %s1561_s6, 1024  ;;  %p1752_p8 = scmp.ne.s32.totalorder %s1747_s12, 0 }
  0x4e   : > { %p1279_p7 = scmp.ne.s32.totalorder %s1561_s6, %s1278_s25  ;;  %s1283_s28 = scalar_lea.hbm %s1733_s3, 4096 }
  0x4f   : > { %p1753_p13 = pneg %p1752_p8  ;;  %p1284_p3 = scmp.lt.u32.totalorder %s1561_s6, %s1733_s3 }
  0x50   : > { %p1285_p9 = scmp.lt.u32.totalorder %s1283_s28, %s1278_s25  ;;  %p1287_p12 = scmp.lt.u32.totalorder %s1278_s25, %s1561_s6 }
  0x51   : > { %p1281_p6 = pnand %p1279_p7, %p1753_p13 }
  0x52   : > { %p1286_p11 = por %p1285_p9, %p1284_p3 }
  0x53   : > { %p1282_p2 = pneg %p1281_p6 }
  0x54   : > { %p1288_p10 = por %p1287_p12, %p1286_p11 }
  0x56   : > { %p1289_p0 = pnand %p1288_p10, %p1282_p2 }
  0x58   : > { %1292 = shalt.err (!%p1289_p0)
}
  0x59   : > { %s1293_s11 = scalar_lea.vmem %s1563_s9, 1024  ;;  %p1754_p1 = pmov %p1753_p13 }
  0x5a   : > { %p1294_p5 = scmp.ne.s32.totalorder %s1563_s9, %s1293_s11  ;;  %s1400_s18 = smov [#allocation7]  }
  0x5b   : > { %s1298_s1 = sshll.u32 %s1400_s18, 4  ;;  %s1299_s1 = int_to_ptr.vmem [resolvable:$false] %s1298_s1 }
  0x5c   : > { %p1296_p4 = pnand %p1294_p5, %p1754_p1  ;;  %s1300_s8 = scalar_lea.vmem %s1299_s1, 2048 }
  0x5d   : > { %p1301_p13 = scmp.lt.s32.totalorder %s1563_s9, %s1299_s1  ;;  %p1302_p6 = scmp.lt.s32.totalorder %s1300_s8, %s1293_s11 }
  0x5e   : > { %p1297_p7 = pneg %p1296_p4 }
  0x5f   : > { %p1303_p3 = por %p1302_p6, %p1301_p13 }
  0x61   : > { %p1304_p9 = pnand %p1303_p3, %p1297_p7 }
  0x63   : > { %1307 = shalt.err (!%p1304_p9)
}
  0x64   : > { %s1755_s10 = smov 4   ;;  %s1756_s14 = smov 64  }
  0x65   : > { %1109 = dma.hbm_to_vmem [thread:$0]  (!%p1752_p8), %s1561_s6, 1024, %s1563_s9, %s1496_s13, %s1756_s14, %s1756_s14, %s1755_s10  }
  0x66   : > { %p1757_p2 = scmp.ne.s32.totalorder %s1749_s17, 0 }
  0x67   : > { %p1758_p11 = scmp.eq.s32.totalorder (!%p1757_p2), %s1528_s15, 0 }
  0x68   : > { %270 = sbr.rel (%p1757_p2) target bundleno = 639 (0x27f), region = 40 }
  0x6f   : > { %1359 = dma.done.wait (%p1758_p11), [#allocation3], 512   ;;  %p1759_p12 = pmov %p1758_p11 }
  0x70   : > { %s276_s12 = sand.u32 1, %s1528_s15   ;;  %s278_s25 = sand.u32 1, %s1376_s19  }
  0x71   : > { %1361 = vsyncadd (%p1759_p12), [#allocation3], 4294966784  ;;  %s959_s7 = sshll.u32 %s278_s25, 8  ;;  %s277_s26 = scalar_lea.sflag [#allocation6], %s276_s12 }
  0x72   : > { %s1623_s28 = scalar_lea.vmem [#allocation5], %s959_s7  ;;  %p1760_p10 = scmp.ne.s32.totalorder %s1748_s16, 0 }
  0x74   : > { %1363 = dma.done.wait (%p1760_p10), %s277_s26, 5120  }
  0x75   : > { %1365 = vsyncadd (%p1760_p10), %s277_s26, 4294962176  ;;  %s960_s13 = sshll.u32 %s278_s25, 6  ;;  %p320_p8 = scmp.lt.s32.totalorder %s1384_s21, 3 }
  0x76   : > { %s1637_s30 = scalar_lea.vmem [#allocation7], %s960_s13  ;;  %p961_p0 = scmp.ne.s32.totalorder %s1384_s21, 0 }
  0x77   : > { %s1631_s17 = scalar_select %p320_p8, %s1384_s21, 3 }
  0x78   : > { %329 = sbr.rel (%p961_p0) target bundleno = 127 (0x7f), region = 56  ;;  %v1401_v0 = vmov (!%p961_p0), 0.0  }
  0x79   : > { %s322_s27 = scalar_lea.vmem %s1732_s2, %s1631_s17  ;;  %330 = vst [vmem:[#allocation8] sm:$0xff] (!%p961_p0), %v1401_v0  ;;  %331 = vst [vmem:[#allocation8 + $0x8] sm:$0xff] (!%p961_p0), %v1401_v0 }
  0x7f PF: > { %v1174_v1 = vld [vmem:[%s1623_s28 + $0x40] sm:$0xff]   ;;  %v1178_v5 = vld [vmem:[%s1623_s28 + $0x48] sm:$0xff]   ;;  %v1182_v9 = vld [vmem:[%s1623_s28 + $0x50] sm:$0xff]   ;;  %v1402_v35 = vmov 0.0   ;;  %vm1403_vm0 = vmmov 0   ;;  %p1007_p5 = scmp.ne.s32.totalorder %s1384_s21, 3 }
  0x80   : > { %v1175_v2 = vld [vmem:[%s1623_s28 + $0xc0] sm:$0xff]   ;;  %1014 = vmatprep.subr.bf16.mxu0 %v1174_v1  ;;  %v1179_v6 = vld [vmem:[%s1623_s28 + $0xc8] sm:$0xff]   ;;  %v1183_v10 = vld [vmem:[%s1623_s28 + $0xd0] sm:$0xff]  }
  0x81   : > { %v1176_v3 = vld [vmem:[%s1623_s28] sm:$0xff]   ;;  %1036 = vmatprep.subr.bf16.mxu1 %v1175_v2  ;;  %v1180_v7 = vld [vmem:[%s1623_s28 + $0x8] sm:$0xff]   ;;  %v1184_v11 = vld [vmem:[%s1623_s28 + $0x10] sm:$0xff]  }
  0x82   : > { %v1177_v4 = vld [vmem:[%s1623_s28 + $0x80] sm:$0xff]   ;;  %1015 = vmatpush3.bf16.msra.mxu0 %v1176_v3  ;;  %v1181_v8 = vld [vmem:[%s1623_s28 + $0x88] sm:$0xff]   ;;  %v1185_v12 = vld [vmem:[%s1623_s28 + $0x90] sm:$0xff]  }
  0x83   : > { %1037 = vmatpush3.bf16.msra.mxu1 %v1177_v4  ;;  %1016 = vmatprep.subr.bf16.mxu0 %v1178_v5  ;;  %v1186_v13 = vld [vmem:[%s1623_s28 + $0x58] sm:$0xff]   ;;  %v1190_v17 = vld [vmem:[%s1623_s28 + $0x60] sm:$0xff]   ;;  %v1194_v21 = vld [vmem:[%s1623_s28 + $0x68] sm:$0xff]  }
  0x84   : > { %1038 = vmatprep.subr.bf16.mxu1 %v1179_v6  ;;  %v1187_v14 = vld [vmem:[%s1623_s28 + $0xd8] sm:$0xff]   ;;  %v1191_v18 = vld [vmem:[%s1623_s28 + $0xe0] sm:$0xff]   ;;  %v1195_v22 = vld [vmem:[%s1623_s28 + $0xe8] sm:$0xff]  }
  0x85   : > { %v1188_v15 = vld [vmem:[%s1623_s28 + $0x18] sm:$0xff]   ;;  %v1192_v19 = vld [vmem:[%s1623_s28 + $0x20] sm:$0xff]   ;;  %v1196_v23 = vld [vmem:[%s1623_s28 + $0x28] sm:$0xff]  }
  0x86   : > { %1017 = vmatpush3.bf16.msra.mxu0 %v1180_v7  ;;  %v1189_v16 = vld [vmem:[%s1623_s28 + $0x98] sm:$0xff]   ;;  %v1193_v20 = vld [vmem:[%s1623_s28 + $0xa0] sm:$0xff]   ;;  %v1197_v24 = vld [vmem:[%s1623_s28 + $0xa8] sm:$0xff]  }
  0x87   : > { %1039 = vmatpush3.bf16.msra.mxu1 %v1181_v8  ;;  %1018 = vmatprep.subr.bf16.mxu0 %v1182_v9  ;;  %v1198_v25 = vld [vmem:[%s1623_s28 + $0x70] sm:$0xff]   ;;  %v1202_v29 = vld [vmem:[%s1623_s28 + $0x78] sm:$0xff]   ;;  %v1212_v38 = vld [vmem:[%s1637_s30] sm:$0xff]  }
  0x88   : > { %1040 = vmatprep.subr.bf16.mxu1 %v1183_v10  ;;  %v1199_v26 = vld [vmem:[%s1623_s28 + $0xf0] sm:$0xff]   ;;  %v1203_v30 = vld [vmem:[%s1623_s28 + $0xf8] sm:$0xff]   ;;  %v1213_v39 = vld [vmem:[%s1637_s30 + $0x8] sm:$0xff]  }
  0x89   : > { %v1200_v27 = vld [vmem:[%s1623_s28 + $0x30] sm:$0xff]   ;;  %v1204_v31 = vld [vmem:[%s1623_s28 + $0x38] sm:$0xff]   ;;  %v1216_v42 = vld [vmem:[%s1637_s30 + $0x20] sm:$0xff]  }
  0x8a   : > { %1019 = vmatpush3.bf16.msra.mxu0 %v1184_v11  ;;  %v1201_v28 = vld [vmem:[%s1623_s28 + $0xb0] sm:$0xff]   ;;  %v1205_v32 = vld [vmem:[%s1623_s28 + $0xb8] sm:$0xff]   ;;  %v1217_v43 = vld [vmem:[%s1637_s30 + $0x28] sm:$0xff]  }
  0x8b   : > { %1041 = vmatpush3.bf16.msra.mxu1 %v1185_v12  ;;  %1020 = vmatprep.subr.bf16.mxu0 %v1186_v13  ;;  %v1206_v33 = vld [vmem:[#allocation2] ss:$16 sps:$4 sm:$0xff]   ;;  %v1208_v34 = vld [vmem:[#allocation2 + $0x4] ss:$16 sps:$4 sm:$0xff]   ;;  %v1209_v36 = vld [vmem:[#allocation2 + $0x8] ss:$16 sps:$4 sm:$0xff]  }
  0x8c   : > { %1042 = vmatprep.subr.bf16.mxu1 %v1187_v14  ;;  %v1211_v37 = vld [vmem:[#allocation2 + $0xc] ss:$16 sps:$4 sm:$0xff]   ;;  %651 = vmatprep.mubr.bf16.mxu0 %v1208_v34  ;;  %v1214_v40 = vld [vmem:[%s1637_s30 + $0x10] sm:$0xff]   ;;  %v962_v48 = vld [vmem:[%s322_s27] ss:$0 sm:$0xff] }
  0x8d   : > { %692 = vmatprep.mubr.bf16.mxu1 %v1211_v37  ;;  %v1215_v41 = vld [vmem:[%s1637_s30 + $0x18] sm:$0xff]   ;;  %v1218_v44 = vld [vmem:[%s1637_s30 + $0x30] sm:$0xff]   ;;  %v703_v2 = vld [vmem:[#allocation8] sm:$0xff] }
  0x8e   : > { %1021 = vmatpush3.bf16.msra.mxu0 %v1188_v15  ;;  %v1219_v45 = vld [vmem:[%s1637_s30 + $0x38] sm:$0xff]   ;;  %v704_v4 = vld [vmem:[#allocation8 + $0x8] sm:$0xff]  ;;  %v1008_v11 = vld [vmem:[%s1734_s4] ss:$0 sm:$0xff] (!%p1007_p5) }
  0x8f   : > { %1043 = vmatpush3.bf16.msra.mxu1 %v1189_v16  ;;  %1022 = vmatprep.subr.bf16.mxu0 %v1190_v17 }
  0x90   : > { %1044 = vmatprep.subr.bf16.mxu1 %v1191_v18 }
  0x92   : > { %1023 = vmatpush3.bf16.msra.mxu0 %v1192_v19 }
  0x93   : > { %1045 = vmatpush3.bf16.msra.mxu1 %v1193_v20  ;;  %1024 = vmatprep.subr.bf16.mxu0 %v1194_v21 }
  0x94   : > { %1046 = vmatprep.subr.bf16.mxu1 %v1195_v22 }
  0x96   : > { %1025 = vmatpush3.bf16.msra.mxu0 %v1196_v23 }
  0x97   : > { %1047 = vmatpush3.bf16.msra.mxu1 %v1197_v24  ;;  %1026 = vmatprep.subr.bf16.mxu0 %v1198_v25 }
  0x98   : > { %1048 = vmatprep.subr.bf16.mxu1 %v1199_v26 }
  0x9a   : > { %1027 = vmatpush3.bf16.msra.mxu0 %v1200_v27 }
  0x9b   : > { %1049 = vmatpush3.bf16.msra.mxu1 %v1201_v28  ;;  %1028 = vmatprep.subr.bf16.mxu0 %v1202_v29 }
  0x9c   : > { %1050 = vmatprep.subr.bf16.mxu1 %v1203_v30 }
  0x9e   : > { %1029 = vmatpush3.bf16.msra.mxu0 %v1204_v31 }
  0x9f   : > { %1051 = vmatpush3.bf16.msra.mxu1 %v1205_v32  ;;  %1067 = vmatprep.subr.bf16.mxu0 %v1402_v35 }
  0xa1   : > { %652 = vmatmul.mubr.bf16.vlgmr.msra.gmra.mrb[0].mxu0 %v1206_v33 }
  0xa2   : > { %693 = vmatmul.mubr.bf16.vlgmr.msra.gmra.mrb[0].mxu1 %v1209_v36  ;;  %1068 = vmatpush3.bf16.msra.mxu0 %v1212_v38 }
  0xa3   : > { %1069 = vmatprep.subr.bf16.mxu0 %v1402_v35  ;;  %1083 = vmatprep.mubr.msk.bf16.mxu0 %vm1403_vm0, %v1402_v35 }
  0xa6   : > { %1070 = vmatpush3.bf16.msra.mxu0 %v1213_v39 }
  0xa7   : > { %1071 = vmatprep.subr.bf16.mxu0 %v1402_v35 }
  0xaa   : > { %1072 = vmatpush3.bf16.msra.mxu0 %v1214_v40 }
  0xab   : > { %1073 = vmatprep.subr.bf16.mxu0 %v1402_v35 }
  0xae   : > { %1074 = vmatpush3.bf16.msra.mxu0 %v1215_v41 }
  0xaf   : > { %1075 = vmatprep.subr.bf16.mxu0 %v1402_v35 }
  0xb2   : > { %1076 = vmatpush3.bf16.msra.mxu0 %v1216_v42 }
  0xb3   : > { %1077 = vmatprep.subr.bf16.mxu0 %v1402_v35 }
  0xb6   : > { %1078 = vmatpush3.bf16.msra.mxu0 %v1217_v43 }
  0xb7   : > { %1079 = vmatprep.subr.bf16.mxu0 %v1402_v35 }
  0xba   : > { %1080 = vmatpush3.bf16.msra.mxu0 %v1218_v44 }
  0xbb   : > { %1081 = vmatprep.subr.bf16.mxu0 %v1402_v35 }
  0xbe   : > { %1082 = vmatpush3.bf16.msra.mxu0 %v1219_v45 }
 0x174   : > { %v1030_v46 = vpop.f32.mrb[0].mxu0 }
 0x175   : > { %v1052_v47 = vpop.f32.mrb[0].mxu1  ;;  %v1031_v49 = vpop.f32.mrb[1].mxu0 }
 0x176   : > { %v1032_v50 = vadd.f32 %v1031_v49, %v1030_v46  ;;  %v1053_v51 = vpop.f32.mrb[1].mxu1  ;;  %v1033_v52 = vpop.f32.mrb[2].mxu0 }
 0x177   : > { %v1054_v53 = vadd.f32 %v1053_v51, %v1052_v47  ;;  %v1055_v54 = vpop.f32.mrb[2].mxu1  ;;  %v1034_v55 = vpop.f32.mrb[3].mxu0 }
 0x178   : > { %v654_v56 = vadd.f32 %v1032_v50, %v962_v48  ;;  %v1035_v57 = vadd.f32 %v1034_v55, %v1033_v52  ;;  %v1056_v58 = vpop.f32.mrb[3].mxu1 }
 0x179   : > { %v1057_v59 = vadd.f32 %v1056_v58, %v1055_v54 }
 0x17a   : > { %v695_v60 = vadd.f32 %v1054_v53, %v654_v56  ;;  %v657_v61 = vadd.f32 %v1035_v57, %v962_v48 }
 0x17c   : > { %v698_v62 = vadd.f32 %v1057_v59, %v657_v61  ;;  %v701_v63 = vmax.f32 %v695_v60, 0.0 }
 0x17e   : > { %v702_v0 = vmax.f32 %v698_v62, 0.0 }
 0x180   : > { %v705_v1 = vpack.c.bf16 %v702_v0, %v701_v63 }
 0x182   : > { %1084 = vmatmul.mubr.bf16.vlgmr.msra.gmra.mrb[4].mxu0 %v705_v1 }
 0x254   : > { %818 = sbr.rel (%p1007_p5) target bundleno = 613 (0x265), region = 60 }
 0x255   : > { %v804_v3 = vpop.f32.mrb[4].mxu0 }
 0x256   : > { %v811_v5 = vadd.f32 %v804_v3, %v703_v2  ;;  %v1085_v6 = vpop.f32.mrb[5].mxu0 }
 0x257   : > { %v807_v7 = vpop.f32.mrb[6].mxu0 }
 0x258   : > { %813 = vst [vmem:[#allocation8] sm:$0xff] %v811_v5  ;;  %v812_v8 = vadd.f32 %v807_v7, %v704_v4  ;;  %v1086_v9 = vpop.f32.mrb[7].mxu0 }
 0x25a   : > { %814 = vst [vmem:[#allocation8 + $0x8] sm:$0xff] %v812_v8 }
 0x25f   : > { %v819_v10 = vld [vmem:[#allocation8] sm:$0xff] }
 0x260   : > { %v828_v13 = vadd.f32 %v1008_v11, %v819_v10 }
 0x261   : > { %v820_v12 = vld [vmem:[#allocation8 + $0x8] sm:$0xff] }
 0x262   : > { %v829_v14 = vadd.f32 %v1008_v11, %v820_v12  ;;  %830 = vst [vmem:[#allocation8] sm:$0xff] %v828_v13 }
 0x264   : > { %831 = vst [vmem:[#allocation8 + $0x8] sm:$0xff] %v829_v14 }
 0x265 PF: > { %p1113_p1 = scmp.eq.s32.totalorder %s1528_s15, 3  ;;  %s1404_s8 = smov [#allocation8]  }
 0x266   : > { %s841_s10 = sshll.u32 %s1404_s8, 4  ;;  %s842_s10 = int_to_ptr.vmem [resolvable:$true] %s841_s10 }
 0x267   : > { %s1308_s14 = scalar_lea.vmem %s842_s10, 256  ;;  %p1315_p6 = scmp.lt.s32.totalorder %s842_s10, %s842_s10 }
 0x268   : > { %p1309_p4 = scmp.ne.s32.totalorder %s842_s10, %s1308_s14  ;;  %p1316_p3 = scmp.lt.s32.totalorder %s1308_s14, %s1308_s14 }
 0x26a   : > { %p1310_p7 = pnand %p1309_p4, %p1113_p1  ;;  %p1317_p9 = por %p1316_p3, %p1315_p6 }
 0x26c   : > { %p1311_p13 = pneg %p1310_p7 }
 0x26e   : > { %p1318_p2 = pnand %p1317_p9, %p1311_p13 }
 0x270   : > { %1321 = shalt.err (!%p1318_p2)
}
 0x271   : > { %s1322_s25 = scalar_lea.hbm %s1735_s5, 256 }
 0x272   : > { %p1323_p11 = scmp.ne.s32.totalorder %s1735_s5, %s1322_s25  ;;  %p1328_p8 = scmp.lt.u32.totalorder %s1322_s25, %s1735_s5 }
 0x274   : > { %p1324_p12 = pnand %p1323_p11, %p1113_p1 }
 0x276   : > { %p1325_p10 = pneg %p1324_p12 }
 0x278   : > { %p1330_p0 = pnand %p1328_p8, %p1325_p10 }
 0x27a   : > { %1333 = shalt.err (!%p1330_p0)
}
 0x27b   : > { %s1405_s17 = smov 128   ;;  %s1406_s6 = smov 8  }
 0x27c   : > { %1096 = dma.vmem_to_hbm [thread:$0]  (%p1113_p1), %s842_s10, 256, %s1735_s5, [#allocation4], %s1405_s17, %s1405_s17, %s1406_s6  }
 0x27d   : > { %1367 = dma.done.wait (%p1113_p1), [#allocation4], 256  }
 0x27e   : > { %1369 = vsyncadd (%p1113_p1), [#allocation4], 4294967040 }
 0x27f PF: > { %s20_s23 = sadd.s32 1, %s1392_s23   ;;  %s1761_s18 = smov %s1376_s19 }
 0x280   : > { %p17_p5 = scmp.ge.s32.totalorder %s20_s23, 6   ;;  %s1762_s19 = smov %s1380_s20 }
 0x281   : > { %s1763_s20 = smov %s1480_s29  ;;  %s1764_s21 = smov %s1388_s22 }
 0x282   : > { %s1765_s22 = smov %s1767_s24  ;;  %19 = sbr.rel (!%p17_p5) target bundleno = 8 (0x8), region = 106 }
 0x289   :  { %857 = vsyncpa [#allocation3], 1 }
 0x28a   :  { %859 = vsyncpa [#allocation3 + $0x1], 1 }
 0x28b   :  { %860 = vsyncpa [#allocation6], 1 }
 0x28c   :  { %862 = vsyncpa [#allocation6 + $0x1], 1 }
 0x28d   :  { %863 = vsyncpa [#allocation4], 1 }
 0x28e   :  { %865 = vsyncpa [#allocation4 + $0x1], 1 }

</bundles_post_ra>
